<compile_context>
chip_gen: v7x
topology: tpu7x:2x2x1
jax: 0.10.0
libtpu: 0.0.40
codegen_flags: <defaults>
</compile_context>

<pallas_src>
import jax
import jax.numpy as jnp
from jax import lax
from jax.experimental import pallas as pl
from jax.experimental.pallas import tpu as pltpu

LANES = 128                    # vreg lane width
NBITS = 4                      # radix bits resolved per pass
NBKT = 1 << NBITS              # thresholds per pass
NPASS = 32 // NBITS            # 8 passes resolve all 32 key bits
MAX_BLOCK_ROWS = 2048          # (2048, 128) f32 tile = 1 MiB per pipeline buffer
VMEM_LIMIT_BYTES = 32 * 1024 * 1024

_SIGN_BIT = -2**31             # 0x8000_0000 as int32
_FLIP_LOW = 2**31 - 1          # 0x7FFF_FFFF as int32
_I32_MAX = 2**31 - 1


def _round_up(a, m):
    return (a + m - 1) // m * m


def _pick_block_rows(r):
    """Rows per grid step: a multiple of 8 (or the full row count), capped at
    MAX_BLOCK_ROWS, and chosen so there are >= 2 blocks when the data is large
    enough -- otherwise one v7x TensorCore idles for every pass."""
    if r % 8 != 0:
        return r if r <= MAX_BLOCK_ROWS else MAX_BLOCK_ROWS
    if r < 16:
        return r
    return min(MAX_BLOCK_ROWS, _round_up(-(-r // 2), 8))


def _make_count_call(n_blocks, block_rows, valid_rows):
    """Per grid step: read one (block_rows, 128) f32 tile, compare its
    order-preserving int32 keys against NBKT SMEM thresholds, reduce the
    sublane axis on the MXU with a single wide bf16 matmul, and store one
    lane-dense (1, NBKT*128) partial-count row for this block."""
    needs_mask = (valid_rows % block_rows) != 0

    def kernel(thr_ref, x_ref, cnt_ref):
        bits = pltpu.bitcast(x_ref[...], jnp.int32)
        # Order-preserving f32 -> int32 key: signed int compare == float compare.
        keys = jnp.where(bits >= 0, bits, bits ^ jnp.int32(_FLIP_LOW))
        if needs_mask:
            # Ragged tail: rows past the real data hold unspecified values;
            # force their keys to INT32_MAX so no threshold ever counts them.
            row = (lax.broadcasted_iota(jnp.int32, keys.shape, 0)
                   + pl.program_id(0) * block_rows)
            keys = jnp.where(row < valid_rows, keys, jnp.int32(_I32_MAX))

        # One wide bf16 matmul replaces 16 small f32 matmuls: 0/1 masks are
        # exact in bf16; counts (<= block_rows <= 2048 << 2^24) are exact in
        # the f32 accumulator, so the int32 cast is exact too.
        ones = jnp.ones((8, block_rows), jnp.bfloat16)
        masks = [(keys < thr_ref[d]).astype(jnp.bfloat16) for d in range(NBKT)]
        wide = jnp.concatenate(masks, axis=1)                   # (BR, NBKT*128)
        partial = jnp.dot(ones, wide,
                          preferred_element_type=jnp.float32)   # (8, NBKT*128)
        cnt_ref[0] = partial[0:1, :].astype(jnp.int32)

    return pl.pallas_call(
        kernel,
        out_shape=jax.ShapeDtypeStruct((n_blocks, 1, NBKT * LANES), jnp.int32),
        grid_spec=pltpu.PrefetchScalarGridSpec(
            num_scalar_prefetch=1,
            grid=(n_blocks,),
            # TODO(synk): pipeline_mode=pl.Buffered(3) on this input spec is a
            # v5e-specific knob worth sweeping now that the MXU work is cheap.
            in_specs=[pl.BlockSpec((block_rows, LANES), lambda i, thr: (i, 0))],
            out_specs=pl.BlockSpec((1, 1, NBKT * LANES),
                                   lambda i, thr: (i, 0, 0)),
        ),
        compiler_params=pltpu.CompilerParams(
            dimension_semantics=("parallel",),
            vmem_limit_bytes=VMEM_LIMIT_BYTES),
    )


def _make_clip_call(n_blocks, block_rows, rows, out_dtype):
    def kernel(eps_ref, x_ref, o_ref):
        # Clamp-from-below with the dtype cast fused in, so no separate XLA
        # convert pass streams the output a second time.
        v = jnp.maximum(x_ref[...].astype(jnp.float32), eps_ref[0, 0])
        o_ref[...] = v.astype(o_ref.dtype)

    # input_output_aliases is intentionally NOT used: on the zero-copy path the
    # clip input is a free reshape of the caller's (non-donated) array.
    return pl.pallas_call(
        kernel,
        out_shape=jax.ShapeDtypeStruct((rows, LANES), out_dtype),
        grid=(n_blocks,),
        in_specs=[
            pl.BlockSpec(memory_space=pltpu.MemorySpace.SMEM),   # eps (1, 1) f32
            pl.BlockSpec((block_rows, LANES), lambda i: (i, 0)),
        ],
        out_specs=pl.BlockSpec((block_rows, LANES), lambda i: (i, 0)),
        compiler_params=pltpu.CompilerParams(
            dimension_semantics=("parallel",),
            vmem_limit_bytes=VMEM_LIMIT_BYTES),
    )


@jax.jit
def clip_10th_percentile(x):
    orig_shape = x.shape
    orig_dtype = x.dtype

    xf = x.reshape(-1)
    n = xf.shape[0]
    k = int(0.1 * n)                     # same 0-indexed rank as torch

    # TODO(synk): bf16 inputs could use 16-bit keys and 4 radix passes (halves
    # HBM traffic on v6e/v7x); kept 32-bit f32 keys for exactness on all floats.
    x32 = xf.astype(jnp.float32)

    rem = n % LANES
    if rem:
        # Pad only when the lane reshape needs it; +inf sorts above all real
        # data, so with k taken from the original numel the rank-k statistic
        # of the padded multiset is unchanged.
        x32 = jnp.pad(x32, (0, LANES - rem), constant_values=float("inf"))
    r = x32.shape[0] // LANES
    x_rows = x32.reshape(r, LANES)       # lane-dense; zero-copy when rem == 0

    block_rows = _pick_block_rows(r)
    n_blocks = -(-r // block_rows)

    count_call = _make_count_call(n_blocks, block_rows, r)

    sign = jnp.int32(_SIGN_BIT)
    flip = jnp.int32(_FLIP_LOW)
    digits = jnp.arange(NBKT, dtype=jnp.int32)

    # Exact radix select of sorted(x)[k]: resolve NBITS key bits per pass.
    # `prefix` holds the resolved high bits in the offset-binary domain.
    # TODO(synk): on v7x the count loop is VALU-bound; NBITS=2 is worth sweeping.
    prefix = jnp.int32(0)
    for p in range(NPASS):
        shift = 32 - NBITS * (p + 1)
        thr = (prefix | (digits << shift)) ^ sign       # signed-comparable keys
        pcnt = count_call(thr, x_rows)                  # (n_blocks, 1, NBKT*128)
        counts = pcnt.reshape(n_blocks, NBKT, LANES).sum(axis=(0, 2))   # (NBKT,)
        # counts is non-decreasing in d and counts[0] <= k, so this picks
        # max{d : #(x < thr[d]) <= k}, i.e. the next NBITS bits of the answer.
        digit = jnp.sum((counts <= k).astype(jnp.int32)) - 1
        prefix = prefix | (digit << shift)

    # prefix == key bits of sorted(x)[k]; map back to float32.
    key_i32 = prefix ^ sign
    eps_bits = jnp.where(key_i32 >= 0, key_i32, key_i32 ^ flip)
    eps = lax.bitcast_convert_type(eps_bits, jnp.float32).reshape(1, 1)

    # TODO(synk): the original .item() host sync has no Pallas equivalent; eps
    # stays on-device and is handed to the clip kernel through SMEM.
    if rem == 0:
        clip_in = x.reshape(r, LANES)    # original dtype, zero-copy
    else:
        clip_in = x_rows                 # padded f32 working copy (rare path)
    out = _make_clip_call(n_blocks, block_rows, r, orig_dtype)(eps, clip_in)

    if rem == 0:
        return out.reshape(orig_shape)
    return out.reshape(-1)[:n].reshape(orig_shape)


if __name__ == "__main__":
    rng = jax.random.PRNGKey(0)
    x = jax.random.normal(rng, (2, 4, 16, 16), dtype=jnp.float32)  # NCHW, numel=2048

    y = jax.block_until_ready(clip_10th_percentile(x))

    # Pure-JAX reference (mirrors the PyTorch forward exactly).
    xf = x.reshape(-1)
    k = int(0.1 * xf.size)
    eps_ref = jnp.sort(xf)[k]
    y_ref = jnp.clip(x, eps_ref)

    assert y.shape == x.shape and y.dtype == x.dtype
    assert jnp.allclose(y, y_ref), "kernel output mismatch vs reference"
    print("KERNEL_OK")
</pallas_src>

<mosaic_0001>
module attributes {stable_mosaic.version = 11 : i64} {
  func.func @kernel(%arg0: i32, %arg1: memref<16xi32, #tpu.memory_space<smem>>, %arg2: memref<8x128xf32, #tpu.memory_space<vmem>>, %arg3: memref<1x1x2048xi32, #tpu.memory_space<vmem>>) attributes {dimension_semantics = [#tpu.dimension_semantics<parallel>], iteration_bounds = array<i64: 2>, scalar_prefetch = 1 : i64, scratch_operands = 0 : i64, tpu.core_type = #tpu.core_type<tc>, window_params = [{transform_indices = @transform_0, window_bounds = array<i64: 8, 128>}, {transform_indices = @transform_1, window_bounds = array<i64: 1, 1, 2048>}]} {
    %c0 = arith.constant 0 : index
    %c0_0 = arith.constant 0 : index
    %0 = vector.load %arg2[%c0, %c0_0] : memref<8x128xf32, #tpu.memory_space<vmem>>, vector<8x128xf32>
    %1 = tpu.bitcast %0 : vector<8x128xf32> -> vector<8x128xi32>
    %c0_i32 = arith.constant 0 : i32
    %2 = vector.broadcast %c0_i32 : i32 to vector<8x128xi32>
    %3 = arith.cmpi sge, %1, %2 : vector<8x128xi32>
    %c2147483647_i32 = arith.constant 2147483647 : i32
    %4 = vector.broadcast %c2147483647_i32 : i32 to vector<8x128xi32>
    %5 = arith.xori %1, %4 : vector<8x128xi32>
    %6 = arith.select %3, %1, %5 : vector<8x128xi1>, vector<8x128xi32>
    %cst = arith.constant 1.000000e+00 : bf16
    %7 = vector.broadcast %cst : bf16 to vector<8x8xbf16>
    %c0_1 = arith.constant 0 : index
    %8 = memref.load %arg1[%c0_1] : memref<16xi32, #tpu.memory_space<smem>>
    %9 = vector.broadcast %8 : i32 to vector<8x128xi32>
    %10 = arith.cmpi slt, %6, %9 : vector<8x128xi32>
    %11 = arith.extui %10 : vector<8x128xi1> to vector<8x128xi32>
    %12 = arith.sitofp %11 : vector<8x128xi32> to vector<8x128xf32>
    %13 = arith.truncf %12 : vector<8x128xf32> to vector<8x128xbf16>
    %c1 = arith.constant 1 : index
    %14 = memref.load %arg1[%c1] : memref<16xi32, #tpu.memory_space<smem>>
    %15 = vector.broadcast %14 : i32 to vector<8x128xi32>
    %16 = arith.cmpi slt, %6, %15 : vector<8x128xi32>
    %17 = arith.extui %16 : vector<8x128xi1> to vector<8x128xi32>
    %18 = arith.sitofp %17 : vector<8x128xi32> to vector<8x128xf32>
    %19 = arith.truncf %18 : vector<8x128xf32> to vector<8x128xbf16>
    %c2 = arith.constant 2 : index
    %20 = memref.load %arg1[%c2] : memref<16xi32, #tpu.memory_space<smem>>
    %21 = vector.broadcast %20 : i32 to vector<8x128xi32>
    %22 = arith.cmpi slt, %6, %21 : vector<8x128xi32>
    %23 = arith.extui %22 : vector<8x128xi1> to vector<8x128xi32>
    %24 = arith.sitofp %23 : vector<8x128xi32> to vector<8x128xf32>
    %25 = arith.truncf %24 : vector<8x128xf32> to vector<8x128xbf16>
    %c3 = arith.constant 3 : index
    %26 = memref.load %arg1[%c3] : memref<16xi32, #tpu.memory_space<smem>>
    %27 = vector.broadcast %26 : i32 to vector<8x128xi32>
    %28 = arith.cmpi slt, %6, %27 : vector<8x128xi32>
    %29 = arith.extui %28 : vector<8x128xi1> to vector<8x128xi32>
    %30 = arith.sitofp %29 : vector<8x128xi32> to vector<8x128xf32>
    %31 = arith.truncf %30 : vector<8x128xf32> to vector<8x128xbf16>
    %c4 = arith.constant 4 : index
    %32 = memref.load %arg1[%c4] : memref<16xi32, #tpu.memory_space<smem>>
    %33 = vector.broadcast %32 : i32 to vector<8x128xi32>
    %34 = arith.cmpi slt, %6, %33 : vector<8x128xi32>
    %35 = arith.extui %34 : vector<8x128xi1> to vector<8x128xi32>
    %36 = arith.sitofp %35 : vector<8x128xi32> to vector<8x128xf32>
    %37 = arith.truncf %36 : vector<8x128xf32> to vector<8x128xbf16>
    %c5 = arith.constant 5 : index
    %38 = memref.load %arg1[%c5] : memref<16xi32, #tpu.memory_space<smem>>
    %39 = vector.broadcast %38 : i32 to vector<8x128xi32>
    %40 = arith.cmpi slt, %6, %39 : vector<8x128xi32>
    %41 = arith.extui %40 : vector<8x128xi1> to vector<8x128xi32>
    %42 = arith.sitofp %41 : vector<8x128xi32> to vector<8x128xf32>
    %43 = arith.truncf %42 : vector<8x128xf32> to vector<8x128xbf16>
    %c6 = arith.constant 6 : index
    %44 = memref.load %arg1[%c6] : memref<16xi32, #tpu.memory_space<smem>>
    %45 = vector.broadcast %44 : i32 to vector<8x128xi32>
    %46 = arith.cmpi slt, %6, %45 : vector<8x128xi32>
    %47 = arith.extui %46 : vector<8x128xi1> to vector<8x128xi32>
    %48 = arith.sitofp %47 : vector<8x128xi32> to vector<8x128xf32>
    %49 = arith.truncf %48 : vector<8x128xf32> to vector<8x128xbf16>
    %c7 = arith.constant 7 : index
    %50 = memref.load %arg1[%c7] : memref<16xi32, #tpu.memory_space<smem>>
    %51 = vector.broadcast %50 : i32 to vector<8x128xi32>
    %52 = arith.cmpi slt, %6, %51 : vector<8x128xi32>
    %53 = arith.extui %52 : vector<8x128xi1> to vector<8x128xi32>
    %54 = arith.sitofp %53 : vector<8x128xi32> to vector<8x128xf32>
    %55 = arith.truncf %54 : vector<8x128xf32> to vector<8x128xbf16>
    %c8 = arith.constant 8 : index
    %56 = memref.load %arg1[%c8] : memref<16xi32, #tpu.memory_space<smem>>
    %57 = vector.broadcast %56 : i32 to vector<8x128xi32>
    %58 = arith.cmpi slt, %6, %57 : vector<8x128xi32>
    %59 = arith.extui %58 : vector<8x128xi1> to vector<8x128xi32>
    %60 = arith.sitofp %59 : vector<8x128xi32> to vector<8x128xf32>
    %61 = arith.truncf %60 : vector<8x128xf32> to vector<8x128xbf16>
    %c9 = arith.constant 9 : index
    %62 = memref.load %arg1[%c9] : memref<16xi32, #tpu.memory_space<smem>>
    %63 = vector.broadcast %62 : i32 to vector<8x128xi32>
    %64 = arith.cmpi slt, %6, %63 : vector<8x128xi32>
    %65 = arith.extui %64 : vector<8x128xi1> to vector<8x128xi32>
    %66 = arith.sitofp %65 : vector<8x128xi32> to vector<8x128xf32>
    %67 = arith.truncf %66 : vector<8x128xf32> to vector<8x128xbf16>
    %c10 = arith.constant 10 : index
    %68 = memref.load %arg1[%c10] : memref<16xi32, #tpu.memory_space<smem>>
    %69 = vector.broadcast %68 : i32 to vector<8x128xi32>
    %70 = arith.cmpi slt, %6, %69 : vector<8x128xi32>
    %71 = arith.extui %70 : vector<8x128xi1> to vector<8x128xi32>
    %72 = arith.sitofp %71 : vector<8x128xi32> to vector<8x128xf32>
    %73 = arith.truncf %72 : vector<8x128xf32> to vector<8x128xbf16>
    %c11 = arith.constant 11 : index
    %74 = memref.load %arg1[%c11] : memref<16xi32, #tpu.memory_space<smem>>
    %75 = vector.broadcast %74 : i32 to vector<8x128xi32>
    %76 = arith.cmpi slt, %6, %75 : vector<8x128xi32>
    %77 = arith.extui %76 : vector<8x128xi1> to vector<8x128xi32>
    %78 = arith.sitofp %77 : vector<8x128xi32> to vector<8x128xf32>
    %79 = arith.truncf %78 : vector<8x128xf32> to vector<8x128xbf16>
    %c12 = arith.constant 12 : index
    %80 = memref.load %arg1[%c12] : memref<16xi32, #tpu.memory_space<smem>>
    %81 = vector.broadcast %80 : i32 to vector<8x128xi32>
    %82 = arith.cmpi slt, %6, %81 : vector<8x128xi32>
    %83 = arith.extui %82 : vector<8x128xi1> to vector<8x128xi32>
    %84 = arith.sitofp %83 : vector<8x128xi32> to vector<8x128xf32>
    %85 = arith.truncf %84 : vector<8x128xf32> to vector<8x128xbf16>
    %c13 = arith.constant 13 : index
    %86 = memref.load %arg1[%c13] : memref<16xi32, #tpu.memory_space<smem>>
    %87 = vector.broadcast %86 : i32 to vector<8x128xi32>
    %88 = arith.cmpi slt, %6, %87 : vector<8x128xi32>
    %89 = arith.extui %88 : vector<8x128xi1> to vector<8x128xi32>
    %90 = arith.sitofp %89 : vector<8x128xi32> to vector<8x128xf32>
    %91 = arith.truncf %90 : vector<8x128xf32> to vector<8x128xbf16>
    %c14 = arith.constant 14 : index
    %92 = memref.load %arg1[%c14] : memref<16xi32, #tpu.memory_space<smem>>
    %93 = vector.broadcast %92 : i32 to vector<8x128xi32>
    %94 = arith.cmpi slt, %6, %93 : vector<8x128xi32>
    %95 = arith.extui %94 : vector<8x128xi1> to vector<8x128xi32>
    %96 = arith.sitofp %95 : vector<8x128xi32> to vector<8x128xf32>
    %97 = arith.truncf %96 : vector<8x128xf32> to vector<8x128xbf16>
    %c15 = arith.constant 15 : index
    %98 = memref.load %arg1[%c15] : memref<16xi32, #tpu.memory_space<smem>>
    %99 = vector.broadcast %98 : i32 to vector<8x128xi32>
    %100 = arith.cmpi slt, %6, %99 : vector<8x128xi32>
    %101 = arith.extui %100 : vector<8x128xi1> to vector<8x128xi32>
    %102 = arith.sitofp %101 : vector<8x128xi32> to vector<8x128xf32>
    %103 = arith.truncf %102 : vector<8x128xf32> to vector<8x128xbf16>
    %104 = tpu.concatenate %13, %19, %25, %31, %37, %43, %49, %55, %61, %67, %73, %79, %85, %91, %97, %103 in 1 : vector<8x128xbf16>, vector<8x128xbf16>, vector<8x128xbf16>, vector<8x128xbf16>, vector<8x128xbf16>, vector<8x128xbf16>, vector<8x128xbf16>, vector<8x128xbf16>, vector<8x128xbf16>, vector<8x128xbf16>, vector<8x128xbf16>, vector<8x128xbf16>, vector<8x128xbf16>, vector<8x128xbf16>, vector<8x128xbf16>, vector<8x128xbf16> -> vector<8x2048xbf16>
    %cst_2 = arith.constant dense<0.000000e+00> : vector<8x2048xf32>
    %105 = tpu.matmul %7, %104, %cst_2 {dimension_numbers = #tpu.dot_dimension_numbers<[1], [0], [0], [1], [0, 0, 1, 1], [], []>} : vector<8x8xbf16>, vector<8x2048xbf16>, vector<8x2048xf32> -> vector<8x2048xf32>
    %106 = vector.extract_strided_slice %105 {offsets = [0, 0], sizes = [1, 2048], strides = [1, 1]} : vector<8x2048xf32> to vector<1x2048xf32>
    %107 = arith.fptosi %106 : vector<1x2048xf32> to vector<1x2048xi32>
    %c0_3 = arith.constant 0 : index
    %c0_4 = arith.constant 0 : index
    %c0_5 = arith.constant 0 : index
    %108 = vector.load %arg3[%c0_3, %c0_4, %c0_5] : memref<1x1x2048xi32, #tpu.memory_space<vmem>>, vector<1x1x2048xi32>
    %109 = vector.shape_cast %108 : vector<1x1x2048xi32> to vector<1x2048xi32>
    %110 = vector.shape_cast %107 : vector<1x2048xi32> to vector<1x1x2048xi32>
    tpu.vector_store %arg3[%c0_3, %c0_4, %c0_5], %110 {strides = array<i32>} : memref<1x1x2048xi32, #tpu.memory_space<vmem>>, vector<1x1x2048xi32>,
    return
  }
  func.func @transform_0(%arg0: i32, %arg1: memref<16xi32, #tpu.memory_space<smem>>) -> (i32, i32) {
    %c0_i32 = arith.constant 0 : i32
    %c0_i32_0 = arith.constant 0 : i32
    return %arg0, %c0_i32 : i32, i32
  }
  func.func @transform_1(%arg0: i32, %arg1: memref<16xi32, #tpu.memory_space<smem>>) -> (i32, i32, i32) {
    %c0_i32 = arith.constant 0 : i32
    %c0_i32_0 = arith.constant 0 : i32
    %c0_i32_1 = arith.constant 0 : i32
    return %arg0, %c0_i32, %c0_i32_0 : i32, i32, i32
  }
}

module attributes {stable_mosaic.version = 11 : i64} {
  func.func @kernel(%arg0: i32, %arg1: memref<1x1xf32, #tpu.memory_space<smem>>, %arg2: memref<8x128xf32, #tpu.memory_space<vmem>>, %arg3: memref<8x128xf32, #tpu.memory_space<vmem>>) attributes {dimension_semantics = [#tpu.dimension_semantics<parallel>], iteration_bounds = array<i64: 2>, scalar_prefetch = 0 : i64, scratch_operands = 0 : i64, tpu.core_type = #tpu.core_type<tc>, window_params = [{transform_indices = @transform_0, window_bounds = array<i64: 1, 1>}, {transform_indices = @transform_1, window_bounds = array<i64: 8, 128>}, {transform_indices = @transform_2, window_bounds = array<i64: 8, 128>}]} {
    %c0 = arith.constant 0 : index
    %c0_0 = arith.constant 0 : index
    %0 = vector.load %arg2[%c0, %c0_0] : memref<8x128xf32, #tpu.memory_space<vmem>>, vector<8x128xf32>
    %c0_1 = arith.constant 0 : index
    %c0_2 = arith.constant 0 : index
    %1 = memref.load %arg1[%c0_1, %c0_2] : memref<1x1xf32, #tpu.memory_space<smem>>
    %2 = vector.broadcast %1 : f32 to vector<8x128xf32>
    %3 = arith.maximumf %0, %2 : vector<8x128xf32>
    %c0_3 = arith.constant 0 : index
    %c0_4 = arith.constant 0 : index
    %4 = vector.load %arg3[%c0_3, %c0_4] : memref<8x128xf32, #tpu.memory_space<vmem>>, vector<8x128xf32>
    tpu.vector_store %arg3[%c0_3, %c0_4], %3 {strides = array<i32>} : memref<8x128xf32, #tpu.memory_space<vmem>>, vector<8x128xf32>,
    return
  }
  func.func @transform_0(%arg0: i32) -> (i32, i32) {
    %c0_i32 = arith.constant 0 : i32
    %c0_i32_0 = arith.constant 0 : i32
    %c0_i32_1 = arith.constant 0 : i32
    return %c0_i32, %c0_i32_0 : i32, i32
  }
  func.func @transform_1(%arg0: i32) -> (i32, i32) {
    %c0_i32 = arith.constant 0 : i32
    %c0_i32_0 = arith.constant 0 : i32
    return %arg0, %c0_i32 : i32, i32
  }
  func.func @transform_2(%arg0: i32) -> (i32, i32) {
    %c0_i32 = arith.constant 0 : i32
    %c0_i32_0 = arith.constant 0 : i32
    return %arg0, %c0_i32 : i32, i32
  }
}

</mosaic_0001>

<bundles_post_ra>
// kernel: clip_10th_percentile.17
= control target key start
LH: loop header
LB: loop body
LE: loop exit
PB: predicated region body
PF: predicated region fallthrough
CT: control target
= control target key end

     0   :  { %s219_s11 = smov 0   ;;  %s247_s0 = inlined_call_operand.<no memory space> [shape: f32[1,1], index: 0, kind: input, shape index: {}]   ;;  %s248_s1 = inlined_call_operand.vmem [shape: f32[16,128], index: 1, kind: input, shape index: {}]   ;;  %s249_s2 = inlined_call_operand.vmem [shape: f32[16,128], index: 2, kind: output, shape index: {}]  }
   0x1   :  { %7 = sst [smem:[#allocation2]] %s247_s0 }
   0x2 LB: > { %s198_s12 = sadd.s32 4294967295, %s221_s11   ;;  %p202_p0 = scmp.ge.s32.totalorder %s221_s11, 1  ;;  %s221_s11 = sphi %s219_s11, %s13_s11  }
   0x3   : > { %p112_p1 = scmp.lt.s32.totalorder %s221_s11, 3 }
   0x5   : > { %p113_p2 = pnand %p202_p0, %p112_p1 }
   0x6   : > { %p132_p3 = scmp.lt.s32.totalorder (!%p113_p2), %s198_s12, 1  ;;  %s141_s13 = sld [smem:[#allocation2]] (!%p113_p2) }
   0x7   : > { %116 = sbr.rel (%p113_p2) target bundleno = 21 (0x15), region = 28 }
   0xc   : > { %v142_v1 = vstv (!%p113_p2), %s141_s13 }
   0xe   : > { %s251_s12 = smov (!%p132_p3, %s198_s12), 1 }
   0xf   : > { %s203_s14 = sshll.u32 %s251_s12, 3 }
  0x10   : > { %s135_s17 = scalar_lea.vmem %s248_s1, %s203_s14  ;;  %s139_s0 = scalar_lea.vmem %s249_s2, %s203_s14 }
  0x11   : > { %v140_v0 = vld [vmem:[%s135_s17] sm:$0xff] }
  0x12   : > { %v143_v2 = vmax.f32 %v140_v0, %v142_v1 }
  0x14   : > { %144 = vst [vmem:[%s139_s0] sm:$0xff] %v143_v2 }
  0x15 PF: > { %s13_s11 = sadd.s32 1, %s221_s11  }
  0x16   : > { %p10_p4 = scmp.ge.s32.totalorder %s13_s11, 4  }
  0x18   :  { %12 = sbr.rel (!%p10_p4) target bundleno = 2 (0x2), region = 58 }

// kernel: clip_10th_percentile.9
= control target key start
LH: loop header
LB: loop body
LE: loop exit
PB: predicated region body
PF: predicated region fallthrough
CT: control target
= control target key end

     0   :  { %s1059_s0 = inlined_call_operand.vmem [shape: s32[16], index: 0, kind: input, shape index: {}]   ;;  %s1060_s1 = inlined_call_operand.vmem [shape: f32[16,128], index: 1, kind: input, shape index: {}]   ;;  %s1061_s2 = inlined_call_operand.vmem [shape: s32[2,1,2048], index: 2, kind: output, shape index: {}]  }
   0x1   :  { %s7_s11 = sshll.u32 %s1059_s0, 4  ;;  %s8_s11 = int_to_ptr.vmem [resolvable:$true] %s7_s11 }
   0x2   :  { %s873_s12 = scalar_lea.vmem %s8_s11, 16  ;;  %p878_p1 = scmp.lt.s32.totalorder %s8_s11, %s8_s11 }
   0x3   :  { %p874_p0 = scmp.ne.s32.totalorder %s8_s11, %s873_s12  ;;  %p879_p2 = scmp.lt.s32.totalorder %s873_s12, %s873_s12 }
   0x5   :  { %p880_p3 = por %p879_p2, %p878_p1 }
   0x7   :  { %p881_p4 = pnand %p880_p3, %p874_p0 }
   0x9   :  { %884 = shalt.err (!%p881_p4)  }
   0xa   :  { %s895_s13 = smov [#allocation3]  }
   0xb   :  { %10 = dma.vmem_to_smem %s8_s11, 16, %s895_s13, [#allocation2] }
   0xc   :  { %889 = dma.done.wait [#allocation2], 16 }
   0xd   :  { %890 = vsyncadd [#allocation2], 4294967280 }
   0xe   :  { %12 = sfence }
   0xf   :  { %s918_s14 = smov 0  }
  0x10 LB: > { %s772_s0 = sadd.s32 4294967295, %s893_s14   ;;  %p776_p5 = scmp.ge.s32.totalorder %s893_s14, 1  ;;  %s893_s14 = sphi %s918_s14, %s18_s14  }
  0x11   : > { %p93_p6 = scmp.lt.s32.totalorder %s893_s14, 3 }
  0x13   : > { %p94_p7 = pnand %p776_p5, %p93_p6 }
  0x14   : > { %p111_p8 = scmp.lt.s32.totalorder (!%p94_p7), %s772_s0, 1  ;;  %s780_s15 = sld [smem:[#allocation3 + $0x1]] (!%p94_p7)  ;;  %v896_v0 = vmov (!%p94_p7), 0   ;;  %vm226_vm1 = vcmask (!%p94_p7), 1043456   ;;  %vm222_vm2 = vcmask (!%p94_p7), 64512   ;;  %v897_v9 = vmov (!%p94_p7), 0.0  }
  0x15   : > { %97 = sbr.rel (%p94_p7) target bundleno = 295 (0x127), region = 24  ;;  %s784_s16 = sld [smem:[#allocation3 + $0x3]] (!%p94_p7)  ;;  %307 = vmatprep.mubr.bf16.mxu0 (!%p94_p7), %v896_v0  ;;  %348 = vmatprep.mubr.bf16.mxu1 (!%p94_p7), %v896_v0  ;;  %v898_v33 = vmov (!%p94_p7), 1065369472   ;;  %v899_v62 = vmov (!%p94_p7), 1966171168  }
  0x16   : > { %s126_s17 = sld [smem:[#allocation3]] (!%p94_p7)  ;;  %s782_s18 = sld [smem:[#allocation3 + $0x2]] (!%p94_p7)  ;;  %v624_v63 = vunpack.c.l.s4 (!%p94_p7), %v899_v62 }
  0x17   : > { %s930_s19 = sld [smem:[#allocation3 + $0x5]] (!%p94_p7)  ;;  %s933_s21 = sld [smem:[#allocation3 + $0x7]] (!%p94_p7) }
  0x18   : > { %s938_s25 = sld [smem:[#allocation3 + $0x4]] (!%p94_p7)  ;;  %s940_s26 = sld [smem:[#allocation3 + $0x6]] (!%p94_p7) }
  0x19   : > { %s942_s27 = sld [smem:[#allocation3 + $0x9]] (!%p94_p7)  ;;  %s947_s28 = sld [smem:[#allocation3 + $0xb]] (!%p94_p7) }
  0x1a   : > { %v133_v2 = vstv (!%p94_p7), %s780_s15  ;;  %s953_s29 = sld [smem:[#allocation3 + $0x8]] (!%p94_p7)  ;;  %s955_s30 = sld [smem:[#allocation3 + $0xa]] (!%p94_p7) }
  0x1b   : > { %v145_v4 = vstv (!%p94_p7), %s784_s16  ;;  %s961_s3 = sld [smem:[#allocation3 + $0xd]] (!%p94_p7)  ;;  %s967_s4 = sld [smem:[#allocation3 + $0xf]] (!%p94_p7) }
  0x1c   : > { %s1063_s0 = smov (!%p111_p8, %s772_s0), 1  ;;  %v127_v5 = vstv %s126_s17  ;;  %v139_v7 = vstv %s782_s18  ;;  %s978_s5 = sld [smem:[#allocation3 + $0xc]] }
  0x1d   : > { %s777_s20 = sshll.u32 %s1063_s0, 3  ;;  %v157_v8 = vstv %s930_s19  ;;  %v169_v18 = vstv %s933_s21  ;;  %s980_s6 = sld [smem:[#allocation3 + $0xe]] }
  0x1e   : > { %s114_s24 = scalar_lea.vmem %s1060_s1, %s777_s20  ;;  %v151_v19 = vstv %s938_s25  ;;  %v163_v20 = vstv %s940_s26  ;;  %s778_s7 = sshll.u32 %s1063_s0, 4 }
  0x1f   : > { %v121_v1 = vld [vmem:[%s114_s24] sm:$0xff]  ;;  %v181_v29 = vstv %s942_s27  ;;  %v193_v32 = vstv %s947_s28  ;;  %s1046_s10 = scalar_lea.vmem %s1061_s2, %s778_s7 }
  0x20   : > { %vm123_vm0 = vcmp.ge.s32.totalorder %v121_v1, 0  ;;  %v124_v3 = vxor.u32 2147483647, %v121_v1  ;;  %v175_v35 = vstv %s953_s29  ;;  %v187_v36 = vstv %s955_s30 }
  0x21   : > { %v205_v42 = vstv %s961_s3  ;;  %v217_v45 = vstv %s967_s4 }
  0x22   : > { %v944_v6 = vsel %vm123_vm0, %v121_v1, %v124_v3  ;;  %v199_v50 = vstv %s978_s5  ;;  %v626_v1 = vlaneseq }
  0x23   : > { %vm134_vm3 = vcmp.lt.s32.totalorder %v944_v6, %v133_v2  ;;  %vm146_vm4 = vcmp.lt.s32.totalorder %v944_v6, %v145_v4  ;;  %vm128_vm5 = vcmp.lt.s32.totalorder %v944_v6, %v127_v5  ;;  %vm140_vm6 = vcmp.lt.s32.totalorder %v944_v6, %v139_v7 }
  0x24   : > { %v781_v10 = vsel %vm134_vm3, 1.0, %v897_v9  ;;  %v785_v11 = vsel %vm146_vm4, 1.0, %v897_v9  ;;  %v779_v12 = vsel %vm128_vm5, 1.0, %v897_v9  ;;  %v783_v13 = vsel %vm140_vm6, 1.0, %v897_v9 }
  0x25   : > { %v137_v14 = vpack.c.bf16 %v781_v10, %v781_v10  ;;  %v149_v15 = vpack.c.bf16 %v785_v11, %v785_v11  ;;  %v131_v16 = vpack.c.bf16 %v779_v12, %v779_v12  ;;  %v143_v17 = vpack.c.bf16 %v783_v13, %v783_v13 }
  0x26   : > { %vm158_vm7 = vcmp.lt.s32.totalorder %v944_v6, %v157_v8  ;;  %vm170_vm8 = vcmp.lt.s32.totalorder %v944_v6, %v169_v18  ;;  %vm152_vm9 = vcmp.lt.s32.totalorder %v944_v6, %v151_v19  ;;  %vm164_vm10 = vcmp.lt.s32.totalorder %v944_v6, %v163_v20 }
  0x27   : > { %810 = vmatprep.subr.msk.bf16.mxu0 %vm226_vm1, %v137_v14  ;;  %812 = vmatprep.subr.msk.bf16.mxu1 %vm226_vm1, %v149_v15  ;;  %v228_v21 = vsel %vm226_vm1, %v131_v16, 0  ;;  %v234_v22 = vsel %vm226_vm1, %v143_v17, 0  ;;  %v789_v23 = vsel %vm158_vm7, 1.0, %v897_v9  ;;  %v793_v25 = vsel %vm170_vm8, 1.0, %v897_v9 }
  0x28   : > { %276 = vmatpush1.bf16.msra.mxu0 %v228_v21  ;;  %317 = vmatpush1.bf16.msra.mxu1 %v234_v22  ;;  %v161_v24 = vpack.c.bf16 %v789_v23, %v789_v23  ;;  %v173_v26 = vpack.c.bf16 %v793_v25, %v793_v25  ;;  %v787_v27 = vsel %vm152_vm9, 1.0, %v897_v9  ;;  %v791_v28 = vsel %vm164_vm10, 1.0, %v897_v9 }
  0x29   : > { %v155_v30 = vpack.c.bf16 %v787_v27, %v787_v27  ;;  %v167_v31 = vpack.c.bf16 %v791_v28, %v791_v28  ;;  %vm182_vm11 = vcmp.lt.s32.totalorder %v944_v6, %v181_v29  ;;  %vm194_vm12 = vcmp.lt.s32.totalorder %v944_v6, %v193_v32 }
  0x2a   : > { %814 = vmatprep.subr.msk.bf16.mxu0 %vm226_vm1, %v161_v24  ;;  %v797_v34 = vsel %vm182_vm11, 1.0, %v897_v9  ;;  %816 = vmatprep.subr.msk.bf16.mxu1 %vm226_vm1, %v173_v26  ;;  %v801_v40 = vsel %vm194_vm12, 1.0, %v897_v9  ;;  %vm176_vm13 = vcmp.lt.s32.totalorder %v944_v6, %v175_v35  ;;  %vm188_vm14 = vcmp.lt.s32.totalorder %v944_v6, %v187_v36 }
  0x2b   : > { %811 = vmatmul.mubr.msk.bf16.vlgmr.msra.gmra.mrb[0].mxu0 %vm222_vm2, %v898_v33  ;;  %813 = vmatmul.mubr.msk.bf16.vlgmr.msra.gmra.mrb[0].mxu1 %vm222_vm2, %v898_v33  ;;  %v240_v37 = vsel %vm226_vm1, %v155_v30, 0  ;;  %v246_v38 = vsel %vm226_vm1, %v167_v31, 0  ;;  %v185_v39 = vpack.c.bf16 %v797_v34, %v797_v34  ;;  %v197_v41 = vpack.c.bf16 %v801_v40, %v801_v40 }
  0x2c   : > { %389 = vmatprep.mubr.bf16.mxu0 %v896_v0  ;;  %358 = vmatpush1.bf16.msra.mxu0 %v240_v37  ;;  %v795_v43 = vsel %vm176_vm13, 1.0, %v897_v9  ;;  %v799_v44 = vsel %vm188_vm14, 1.0, %v897_v9  ;;  %vm206_vm15 = vcmp.lt.s32.totalorder %v944_v6, %v205_v42  ;;  %vm218_vm0 = vcmp.lt.s32.totalorder %v944_v6, %v217_v45 }
  0x2d   : > { %399 = vmatpush1.bf16.msra.mxu1 %v246_v38  ;;  %430 = vmatprep.mubr.bf16.mxu1 %v896_v0  ;;  %v179_v46 = vpack.c.bf16 %v795_v43, %v795_v43  ;;  %v191_v47 = vpack.c.bf16 %v799_v44, %v799_v44  ;;  %v805_v48 = vsel %vm206_vm15, 1.0, %v897_v9  ;;  %v809_v49 = vsel %vm218_vm0, 1.0, %v897_v9 }
  0x2e   : > { %818 = vmatprep.subr.msk.bf16.mxu0 %vm226_vm1, %v185_v39  ;;  %820 = vmatprep.subr.msk.bf16.mxu1 %vm226_vm1, %v197_v41  ;;  %v211_v51 = vstv %s980_s6  ;;  %vm200_vm3 = vcmp.lt.s32.totalorder %v944_v6, %v199_v50  ;;  %v209_v54 = vpack.c.bf16 %v805_v48, %v805_v48  ;;  %v221_v55 = vpack.c.bf16 %v809_v49, %v809_v49 }
  0x2f   : > { %v252_v52 = vsel %vm226_vm1, %v179_v46, 0  ;;  %v258_v53 = vsel %vm226_vm1, %v191_v47, 0  ;;  %v803_v56 = vsel %vm200_vm3, 1.0, %v897_v9  ;;  %vm212_vm4 = vcmp.lt.s32.totalorder %v944_v6, %v211_v51 }
  0x30   : > { %v807_v57 = vsel %vm212_vm4, 1.0, %v897_v9  ;;  %v203_v58 = vpack.c.bf16 %v803_v56, %v803_v56  ;;  %v625_v4 = vunpack.c.0.s8 %v624_v63  ;;  %v627_v5 = vshrl.u32 %v626_v1, 7 }
  0x31   : > { %v215_v59 = vpack.c.bf16 %v807_v57, %v807_v57 }
  0x32   : > { %v264_v60 = vsel %vm226_vm1, %v203_v58, 0  ;;  %v1034_v18 = vsub.s32 %v625_v4, %v627_v5 }
  0x33   : > { %815 = vmatmul.mubr.msk.bf16.vlgmr.msra.gmra.mrb[4].mxu0 %vm222_vm2, %v898_v33  ;;  %817 = vmatmul.mubr.msk.bf16.vlgmr.msra.gmra.mrb[4].mxu1 %vm222_vm2, %v898_v33  ;;  %v270_v61 = vsel %vm226_vm1, %v215_v59, 0 }
  0x34   : > { %440 = vmatpush1.bf16.msra.mxu0 %v252_v52  ;;  %481 = vmatpush1.bf16.msra.mxu1 %v258_v53 }
  0x35   : > { %471 = vmatprep.mubr.bf16.mxu0 %v896_v0  ;;  %512 = vmatprep.mubr.bf16.mxu1 %v896_v0 }
  0x36   : > { %822 = vmatprep.subr.msk.bf16.mxu0 %vm226_vm1, %v209_v54  ;;  %824 = vmatprep.subr.msk.bf16.mxu1 %vm226_vm1, %v221_v55 }
  0x3b   : > { %819 = vmatmul.mubr.msk.bf16.vlgmr.msra.gmra.mrb[8].mxu0 %vm222_vm2, %v898_v33  ;;  %821 = vmatmul.mubr.msk.bf16.vlgmr.msra.gmra.mrb[8].mxu1 %vm222_vm2, %v898_v33 }
  0x3c   : > { %522 = vmatpush1.bf16.msra.mxu0 %v264_v60  ;;  %563 = vmatpush1.bf16.msra.mxu1 %v270_v61 }
  0x3d   : > { %553 = vmatprep.mubr.bf16.mxu0 %v896_v0  ;;  %594 = vmatprep.mubr.bf16.mxu1 %v896_v0 }
  0x43   : > { %823 = vmatmul.mubr.msk.bf16.vlgmr.msra.gmra.mrb[12].mxu0 %vm222_vm2, %v898_v33  ;;  %825 = vmatmul.mubr.msk.bf16.vlgmr.msra.gmra.mrb[12].mxu1 %vm222_vm2, %v898_v33 }
  0xfe   : > { %v309_v2 = vpop.f32.mrb[0].mxu0  ;;  %v350_v3 = vpop.f32.mrb[0].mxu1 }
  0xff   : > { %v828_v6 = vtrunc.f32 %v309_v2  ;;  %v832_v7 = vtrunc.f32 %v350_v3  ;;  %v311_v8 = vpop.f32.mrb[1].mxu0  ;;  %v352_v9 = vpop.f32.mrb[1].mxu1 }
 0x100   : > { %v830_v10 = vtrunc.f32 %v311_v8  ;;  %v834_v11 = vtrunc.f32 %v352_v9  ;;  %v313_v12 = vpop.f32.mrb[2].mxu0  ;;  %v354_v13 = vpop.f32.mrb[2].mxu1 }
 0x101   : > { %v829_v0 = vcvt.f32.s32 %v828_v6  ;;  %v833_v14 = vcvt.f32.s32 %v832_v7  ;;  %v314_v15 = vpop.f32.mrb[3].mxu0  ;;  %v355_v16 = vpop.f32.mrb[3].mxu1 }
 0x102   : > { %v831_v17 = vcvt.f32.s32 %v830_v10  ;;  %v835_v19 = vcvt.f32.s32 %v834_v11 }
 0x104   : > { %v619_v20 = vcombine.low %v829_v0, %v831_v17  ;;  %v620_v21 = vcombine.low %v833_v14, %v835_v19 }
 0x106   : > { %v629_v22 = vrot.slane %v619_v20, %v1034_v18  ;;  %v636_v23 = vrot.slane %v620_v21, %v1034_v18  ;;  %v391_v24 = vpop.f32.mrb[4].mxu0  ;;  %v432_v25 = vpop.f32.mrb[4].mxu1 }
 0x107   : > { %v836_v26 = vtrunc.f32 %v391_v24  ;;  %v840_v27 = vtrunc.f32 %v432_v25  ;;  %v393_v28 = vpop.f32.mrb[5].mxu0  ;;  %v434_v29 = vpop.f32.mrb[5].mxu1 }
 0x108   : > { %v651_v30 = vcombine.low %v629_v22, %v636_v23  ;;  %v838_v31 = vtrunc.f32 %v393_v28  ;;  %v842_v32 = vtrunc.f32 %v434_v29  ;;  %v395_v33 = vpop.f32.mrb[6].mxu0  ;;  %v436_v34 = vpop.f32.mrb[6].mxu1 }
 0x109   : > { %v837_v35 = vcvt.f32.s32 %v836_v26  ;;  %v841_v36 = vcvt.f32.s32 %v840_v27  ;;  %v396_v37 = vpop.f32.mrb[7].mxu0  ;;  %v437_v38 = vpop.f32.mrb[7].mxu1 }
 0x10a   : > { %v839_v39 = vcvt.f32.s32 %v838_v31  ;;  %v843_v40 = vcvt.f32.s32 %v842_v32  ;;  %v659_v60 = vrot.slane %v651_v30, %v1034_v18 }
 0x10c   : > { %v621_v41 = vcombine.low %v837_v35, %v839_v39  ;;  %v622_v42 = vcombine.low %v841_v36, %v843_v40 }
 0x10e   : > { %v643_v43 = vrot.slane %v621_v41, %v1034_v18  ;;  %v650_v44 = vrot.slane %v622_v42, %v1034_v18  ;;  %v473_v45 = vpop.f32.mrb[8].mxu0  ;;  %v514_v46 = vpop.f32.mrb[8].mxu1 }
 0x10f   : > { %v844_v47 = vtrunc.f32 %v473_v45  ;;  %v848_v48 = vtrunc.f32 %v514_v46  ;;  %v475_v49 = vpop.f32.mrb[9].mxu0  ;;  %v516_v50 = vpop.f32.mrb[9].mxu1 }
 0x110   : > { %v652_v51 = vcombine.low %v643_v43, %v650_v44  ;;  %v846_v52 = vtrunc.f32 %v475_v49  ;;  %v850_v53 = vtrunc.f32 %v516_v50  ;;  %v477_v54 = vpop.f32.mrb[10].mxu0  ;;  %v518_v55 = vpop.f32.mrb[10].mxu1 }
 0x111   : > { %v845_v56 = vcvt.f32.s32 %v844_v47  ;;  %v849_v57 = vcvt.f32.s32 %v848_v48  ;;  %v478_v58 = vpop.f32.mrb[11].mxu0  ;;  %v519_v59 = vpop.f32.mrb[11].mxu1 }
 0x112   : > { %v666_v61 = vrot.slane %v652_v51, %v1034_v18  ;;  %v847_v62 = vcvt.f32.s32 %v846_v52  ;;  %v851_v63 = vcvt.f32.s32 %v850_v53 }
 0x114   : > { %v667_v1 = vcombine.low %v659_v60, %v666_v61  ;;  %v668_v2 = vcombine.low %v845_v56, %v847_v62  ;;  %v669_v3 = vcombine.low %v849_v57, %v851_v63 }
 0x116   : > { %717 = vst [vmem:[%s1046_s10] sm:$0xff] %v667_v1  ;;  %v678_v4 = vrot.slane %v668_v2, %v1034_v18  ;;  %v685_v5 = vrot.slane %v669_v3, %v1034_v18  ;;  %v555_v6 = vpop.f32.mrb[12].mxu0  ;;  %v596_v7 = vpop.f32.mrb[12].mxu1 }
 0x117   : > { %v852_v8 = vtrunc.f32 %v555_v6  ;;  %v856_v9 = vtrunc.f32 %v596_v7  ;;  %v557_v10 = vpop.f32.mrb[13].mxu0  ;;  %v598_v11 = vpop.f32.mrb[13].mxu1 }
 0x118   : > { %v700_v12 = vcombine.low %v678_v4, %v685_v5  ;;  %v854_v13 = vtrunc.f32 %v557_v10  ;;  %v858_v0 = vtrunc.f32 %v598_v11  ;;  %v559_v14 = vpop.f32.mrb[14].mxu0  ;;  %v600_v15 = vpop.f32.mrb[14].mxu1 }
 0x119   : > { %v853_v16 = vcvt.f32.s32 %v852_v8  ;;  %v857_v17 = vcvt.f32.s32 %v856_v9  ;;  %v560_v19 = vpop.f32.mrb[15].mxu0  ;;  %v601_v20 = vpop.f32.mrb[15].mxu1 }
 0x11a   : > { %v855_v21 = vcvt.f32.s32 %v854_v13  ;;  %v859_v22 = vcvt.f32.s32 %v858_v0  ;;  %v708_v28 = vrot.slane %v700_v12, %v1034_v18 }
 0x11c   : > { %v670_v23 = vcombine.low %v853_v16, %v855_v21  ;;  %v671_v24 = vcombine.low %v857_v17, %v859_v22 }
 0x11e   : > { %v692_v25 = vrot.slane %v670_v23, %v1034_v18  ;;  %v699_v26 = vrot.slane %v671_v24, %v1034_v18 }
 0x120   : > { %v701_v27 = vcombine.low %v692_v25, %v699_v26 }
 0x122   : > { %v715_v29 = vrot.slane %v701_v27, %v1034_v18 }
 0x124   : > { %v716_v30 = vcombine.low %v708_v28, %v715_v29 }
 0x126   : > { %718 = vst [vmem:[%s1046_s10 + $0x8] sm:$0xff] %v716_v30 }
 0x127 PF: > { %s18_s14 = sadd.s32 1, %s893_s14  }
 0x128   : > { %p15_p9 = scmp.ge.s32.totalorder %s18_s14, 4  }
 0x12a   :  { %17 = sbr.rel (!%p15_p9) target bundleno = 16 (0x10), region = 54 }

</bundles_post_ra>
